<compile_context>
chip_gen: v7x
topology: tpu7x:2x2x1
jax: 0.10.0
libtpu: 0.0.40
codegen_flags: <defaults>
</compile_context>

<pallas_src>
import functools

import jax
import jax.numpy as jnp
from jax import lax
from jax.experimental import pallas as pl
from jax.experimental.pallas import tpu as pltpu


def _round_up(x, m):
    return ((x + m - 1) // m) * m


def _mix32(x):
    # murmur3-style 32-bit finalizer; uint32 ops wrap on overflow.
    x = x ^ (x >> 16)
    x = x * jnp.uint32(0x85EBCA6B)
    x = x ^ (x >> 13)
    x = x * jnp.uint32(0xC2B2AE35)
    x = x ^ (x >> 16)
    return x


def _apply_dropout(h, seed_ref, drop_rate, row_off, col_off, hidden_total):
    # Stateless dropout keyed on the flattened global index (row*H + col, seed).
    # Deterministic and invariant to the tiling; rides in spare VPU slots.
    rows = lax.broadcasted_iota(jnp.int32, h.shape, 0) + row_off
    cols = lax.broadcasted_iota(jnp.int32, h.shape, 1) + col_off
    idx = rows.astype(jnp.uint32) * jnp.uint32(hidden_total) + cols.astype(jnp.uint32)
    key = idx * jnp.uint32(0x9E3779B1) + seed_ref[0].astype(jnp.uint32) * jnp.uint32(0xC2B2AE3D)
    bits = _mix32(key)
    keep_prob = 1.0 - drop_rate
    thresh = jnp.uint32(min(int(keep_prob * (2 ** 32)), 2 ** 32 - 1))
    return jnp.where(bits < thresh, h * (1.0 / keep_prob), 0.0)


# ---------------------------------------------------------------------------
# Kernels
# ---------------------------------------------------------------------------

def ffn_resident_kernel(seed_ref, x_ref, w1_ref, b1_ref, w2_ref, b2_ref, o_ref, *,
                        drop_rate, tile_m, hidden_total):
    """Weights fully resident in VMEM; grid = (row tiles,)."""
    h = jnp.dot(x_ref[...], w1_ref[...], preferred_element_type=jnp.float32)
    h = jnp.maximum(h + b1_ref[...].astype(jnp.float32), 0.0)
    if drop_rate > 0.0:
        h = _apply_dropout(h, seed_ref, drop_rate,
                           pl.program_id(0) * tile_m, 0, hidden_total)
    y = jnp.dot(h.astype(w2_ref.dtype), w2_ref[...],
                preferred_element_type=jnp.float32)
    o_ref[...] = (y + b2_ref[...].astype(jnp.float32)).astype(o_ref.dtype)


def ffn_stream_kernel_f32(seed_ref, x_ref, w1_ref, b1_ref, w2_ref, b2_ref, o_ref, *,
                          drop_rate, tile_m, tile_h, hidden_total):
    """Hidden-dim streaming; f32 output tile doubles as the accumulator."""
    j = pl.program_id(1)

    @pl.when(j == 0)
    def _init():
        o_ref[...] = jnp.broadcast_to(b2_ref[...].astype(o_ref.dtype), o_ref.shape)

    h = jnp.dot(x_ref[...], w1_ref[...], preferred_element_type=jnp.float32)
    h = jnp.maximum(h + b1_ref[...].astype(jnp.float32), 0.0)
    if drop_rate > 0.0:
        h = _apply_dropout(h, seed_ref, drop_rate,
                           pl.program_id(0) * tile_m, j * tile_h, hidden_total)
    o_ref[...] += jnp.dot(h.astype(w2_ref.dtype), w2_ref[...],
                          preferred_element_type=jnp.float32)


def ffn_stream_kernel_acc(seed_ref, x_ref, w1_ref, b1_ref, w2_ref, b2_ref, o_ref,
                          acc_ref, *, drop_rate, tile_m, tile_h, hidden_total):
    """Hidden-dim streaming with f32 scratch accumulator (non-f32 outputs)."""
    j = pl.program_id(1)

    @pl.when(j == 0)
    def _init():
        acc_ref[...] = jnp.broadcast_to(b2_ref[...].astype(jnp.float32), acc_ref.shape)

    h = jnp.dot(x_ref[...], w1_ref[...], preferred_element_type=jnp.float32)
    h = jnp.maximum(h + b1_ref[...].astype(jnp.float32), 0.0)
    if drop_rate > 0.0:
        h = _apply_dropout(h, seed_ref, drop_rate,
                           pl.program_id(0) * tile_m, j * tile_h, hidden_total)
    acc_ref[...] += jnp.dot(h.astype(w2_ref.dtype), w2_ref[...],
                            preferred_element_type=jnp.float32)

    @pl.when(j == pl.num_programs(1) - 1)
    def _finalize():
        o_ref[...] = acc_ref[...].astype(o_ref.dtype)


# ---------------------------------------------------------------------------
# Wrapper
# ---------------------------------------------------------------------------

def _vmem_capacity_bytes():
    try:
        return int(pltpu.get_tpu_info().vmem_capacity_bytes)
    except Exception:
        return 64 << 20  # conservative: v7x per-TensorCore capacity


def _default_block_rows():
    try:
        kind = jax.devices()[0].device_kind.lower()
    except Exception:
        kind = ""
    if "v5" in kind:
        return 256   # v5e roofline (~240 flops/byte) already met at TM=256
    if "v6" in kind:
        return 768   # v6e needs ~656 flops/byte against streamed weights
    return 512       # v7x / unknown: ~311 flops/byte, only 64 MiB VMEM


def _pick_hidden_tile(h_total, cap):
    # Largest divisor of h_total <= cap that is a multiple of 256, else 128.
    for mult in (256, 128):
        t = (min(cap, h_total) // mult) * mult
        while t >= mult:
            if h_total % t == 0:
                return t
            t -= mult
    return h_total


def feedforward_pallas(x2d, w1, b1, w2, b2, *, drop_rate=0.0, seed=0,
                       block_rows=None, block_hidden=512, force_stream=False):
    N, D = x2d.shape
    Dw, H = w1.shape
    assert Dw == D and w2.shape == (H, D)

    out_dtype = x2d.dtype
    bpe_x = jnp.dtype(x2d.dtype).itemsize
    bpe_w = jnp.dtype(w1.dtype).itemsize
    bpe_o = jnp.dtype(out_dtype).itemsize

    # Feature dims padded to lane-dense multiples of 128.
    D_pad = _round_up(D, 128)
    H_pad = _round_up(H, 128)

    # Row tile: dtype-aware sublane multiple (8 f32 / 16 bf16 / 32 int8-fp8),
    # multiples of 256 when large (native MXU granularity on v6e/v7x).
    sub_mult = max(8, 32 // bpe_x)
    if block_rows is None:
        block_rows = _default_block_rows()
    TM = min(block_rows, _round_up(N, sub_mult))
    if TM > 256:
        TM = _round_up(TM, 256)
    # Keep >=2 row tiles for large N so both TensorCores (megacore / v7x) work.
    if N > 2 * 256:
        TM = min(TM, _round_up((N + 1) // 2, 256))

    vmem_cap = _vmem_capacity_bytes()
    vmem_budget = max(16 << 20, vmem_cap - (8 << 20))  # headroom for internal scratch

    def resident_need(tm):
        return (2 * tm * D_pad * bpe_x                      # x tiles (dbl buffered)
                + 2 * tm * D_pad * bpe_o                    # out tiles
                + 2 * (D_pad * H_pad + H_pad * D_pad + H_pad + D_pad) * bpe_w
                + 3 * tm * H_pad * 4)                       # h + dropout temporaries

    def stream_need(tm, th):
        acc = 0 if out_dtype == jnp.float32 else tm * D_pad * 4
        return (2 * tm * D_pad * bpe_x
                + 2 * tm * D_pad * bpe_o
                + 2 * (D_pad * th + th * D_pad + th + D_pad) * bpe_w
                + acc
                + 3 * tm * th * 4)

    weights_resident = (not force_stream) and resident_need(TM) <= vmem_budget

    w1_p = jnp.pad(w1, ((0, D_pad - D), (0, H_pad - H)))
    b1_p = jnp.pad(b1.reshape(1, -1), ((0, 0), (0, H_pad - H)))
    w2_p = jnp.pad(w2, ((0, H_pad - H), (0, D_pad - D)))
    b2_p = jnp.pad(b2.reshape(1, -1), ((0, 0), (0, D_pad - D)))
    seed_arr = jnp.array([seed], dtype=jnp.int32)
    weight_bytes = (w1_p.size + w2_p.size + b1_p.size + b2_p.size) * bpe_w

    if weights_resident:
        N_pad = _round_up(N, TM)
        x_p = jnp.pad(x2d, ((0, N_pad - N), (0, D_pad - D)))

        grid = (N_pad // TM,)
        flops = 4 * N_pad * D_pad * H_pad
        bytes_accessed = N_pad * D_pad * (bpe_x + bpe_o) + weight_bytes
        need = resident_need(TM)
        vmem_limit = min(max(int(need * 1.25) + (2 << 20), 16 << 20), vmem_budget)

        kernel = functools.partial(ffn_resident_kernel, drop_rate=drop_rate,
                                   tile_m=TM, hidden_total=H_pad)
        out = pl.pallas_call(
            kernel,
            out_shape=jax.ShapeDtypeStruct((N_pad, D_pad), out_dtype),
            grid_spec=pltpu.PrefetchScalarGridSpec(
                num_scalar_prefetch=1,
                grid=grid,
                in_specs=[
                    pl.BlockSpec((TM, D_pad), lambda i, s: (i, 0)),        # x
                    pl.BlockSpec((D_pad, H_pad), lambda i, s: (0, 0)),     # w1 (resident)
                    pl.BlockSpec((1, H_pad), lambda i, s: (0, 0)),         # b1
                    pl.BlockSpec((H_pad, D_pad), lambda i, s: (0, 0)),     # w2 (resident)
                    pl.BlockSpec((1, D_pad), lambda i, s: (0, 0)),         # b2
                ],
                out_specs=pl.BlockSpec((TM, D_pad), lambda i, s: (i, 0)),
            ),
            compiler_params=pltpu.CompilerParams(
                dimension_semantics=("parallel",),
                vmem_limit_bytes=vmem_limit,
            ),
            cost_estimate=pl.CostEstimate(flops=flops, transcendentals=0,
                                          bytes_accessed=bytes_accessed),
        )(seed_arr, x_p, w1_p, b1_p, w2_p, b2_p)
        return out[:N, :D]

    # -------------------- hidden-streaming path --------------------
    TH = _pick_hidden_tile(H_pad, block_hidden)
    while stream_need(TM, TH) > vmem_budget:
        if TH > 256:
            TH = _pick_hidden_tile(H_pad, TH - 128)
        elif TM > 256:
            TM -= 256
        elif TM > sub_mult:
            TM = max(sub_mult, TM // 2)
        else:
            break

    N_pad = _round_up(N, TM)
    x_p = jnp.pad(x2d, ((0, N_pad - N), (0, D_pad - D)))

    grid = (N_pad // TM, H_pad // TH)
    n_row_tiles = grid[0]
    flops = 4 * N_pad * D_pad * H_pad
    # Weights are re-fetched once per row tile when streamed.
    bytes_accessed = N_pad * D_pad * (bpe_x + bpe_o) + n_row_tiles * weight_bytes
    need = stream_need(TM, TH)
    vmem_limit = min(max(int(need * 1.25) + (2 << 20), 16 << 20), vmem_budget)

    f32_out = out_dtype == jnp.float32
    if f32_out:
        kernel = functools.partial(ffn_stream_kernel_f32, drop_rate=drop_rate,
                                   tile_m=TM, tile_h=TH, hidden_total=H_pad)
        scratch_shapes = []
    else:
        kernel = functools.partial(ffn_stream_kernel_acc, drop_rate=drop_rate,
                                   tile_m=TM, tile_h=TH, hidden_total=H_pad)
        scratch_shapes = [pltpu.VMEM((TM, D_pad), jnp.float32)]

    # TODO(synk): optionally pl.Buffered(3) on w1/w2 (v6e, VMEM permitting) and an
    # fp8 weight path on v7x once the kernel is roofline-bound.
    out = pl.pallas_call(
        kernel,
        out_shape=jax.ShapeDtypeStruct((N_pad, D_pad), out_dtype),
        grid_spec=pltpu.PrefetchScalarGridSpec(
            num_scalar_prefetch=1,
            grid=grid,
            in_specs=[
                pl.BlockSpec((TM, D_pad), lambda i, j, s: (i, 0)),   # x
                pl.BlockSpec((D_pad, TH), lambda i, j, s: (0, j)),   # w1 tile
                pl.BlockSpec((1, TH), lambda i, j, s: (0, j)),       # b1 tile
                pl.BlockSpec((TH, D_pad), lambda i, j, s: (j, 0)),   # w2 tile
                pl.BlockSpec((1, D_pad), lambda i, j, s: (0, 0)),    # b2
            ],
            out_specs=pl.BlockSpec((TM, D_pad), lambda i, j, s: (i, 0)),
            scratch_shapes=scratch_shapes,
        ),
        compiler_params=pltpu.CompilerParams(
            dimension_semantics=("parallel", "arbitrary"),
            vmem_limit_bytes=vmem_limit,
        ),
        cost_estimate=pl.CostEstimate(flops=flops, transcendentals=0,
                                      bytes_accessed=bytes_accessed),
    )(seed_arr, x_p, w1_p, b1_p, w2_p, b2_p)
    return out[:N, :D]


def feedforward(x, params, *, drop_rate=0.0, seed=0, **kw):
    """x: [B, T, D] -> [B, T, D] (matches PyTorch FeedForward.forward)."""
    B, T, D = x.shape
    y = feedforward_pallas(
        x.reshape(B * T, D),
        params["w1"], params["b1"], params["w2"], params["b2"],
        drop_rate=drop_rate, seed=seed, **kw,
    )
    return y.reshape(B, T, D)


def init_params(key, emb_dim, dtype=jnp.float32):
    """PyTorch-style Linear init: U(-1/sqrt(fan_in), 1/sqrt(fan_in))."""
    hidden = emb_dim * 4
    k1, k2, k3, k4 = jax.random.split(key, 4)
    bound1 = 1.0 / (emb_dim ** 0.5)
    bound2 = 1.0 / (hidden ** 0.5)
    # stored as [in, out] (transpose of PyTorch's [out, in])
    w1 = jax.random.uniform(k1, (emb_dim, hidden), dtype, -bound1, bound1)
    b1 = jax.random.uniform(k2, (1, hidden), dtype, -bound1, bound1)
    w2 = jax.random.uniform(k3, (hidden, emb_dim), dtype, -bound2, bound2)
    b2 = jax.random.uniform(k4, (1, emb_dim), dtype, -bound2, bound2)
    return {"w1": w1, "b1": b1, "w2": w2, "b2": b2}


def _reference(x, params):
    h = jnp.maximum(x @ params["w1"] + params["b1"][0], 0.0)
    return h @ params["w2"] + params["b2"][0]


if __name__ == "__main__":
    key = jax.random.PRNGKey(0)

    # ---- Test 1: weights-resident path (default), dropout off vs reference ----
    cfg = {"emb_dim": 32, "drop_rate": 0.1}
    batch, seq = 2, 8
    kx, kp, kx2, kp2 = jax.random.split(key, 4)
    x = jax.random.normal(kx, (batch, seq, cfg["emb_dim"]), dtype=jnp.float32)
    params = init_params(kp, cfg["emb_dim"])

    y_nodrop = feedforward(x, params, drop_rate=0.0)
    y_ref = _reference(x, params)
    assert jnp.allclose(y_nodrop, y_ref, atol=1e-5, rtol=1e-5), "resident path mismatch"

    # Train-mode dropout as in the PyTorch module.
    # TODO(synk): dropout RNG stream is a stateless hash, not bit-identical to torch's.
    y = feedforward(x, params, drop_rate=cfg["drop_rate"], seed=1234)
    jax.block_until_ready(y)
    assert y.shape == x.shape and y.dtype == x.dtype
    assert bool(jnp.all(jnp.isfinite(y)))

    # ---- Test 2: hidden-streaming path (f32 output, accumulate in o_ref) ----
    emb2 = 64  # hidden = 256 -> two hidden tiles with block_hidden=128
    x2 = jax.random.normal(kx2, (batch, seq, emb2), dtype=jnp.float32)
    params2 = init_params(kp2, emb2)
    y2 = feedforward(x2, params2, drop_rate=0.0, force_stream=True, block_hidden=128)
    assert jnp.allclose(y2, _reference(x2, params2), atol=1e-5, rtol=1e-5), \
        "streaming f32 path mismatch"

    # ---- Test 3: hidden-streaming path with f32 scratch accumulator (bf16) ----
    xb = x2.astype(jnp.bfloat16)
    pb = {k: v.astype(jnp.bfloat16) for k, v in params2.items()}
    yb = feedforward(xb, pb, drop_rate=0.0, force_stream=True, block_hidden=128)
    yb_ref = _reference(xb.astype(jnp.float32),
                        {k: v.astype(jnp.float32) for k, v in pb.items()})
    assert yb.dtype == jnp.bfloat16
    assert jnp.allclose(yb.astype(jnp.float32), yb_ref, atol=3e-2, rtol=3e-2), \
        "streaming bf16 path mismatch"

    jax.block_until_ready((y, y2, yb))
    print("KERNEL_OK")
</pallas_src>

<mosaic_0001>
module attributes {stable_mosaic.version = 11 : i64} {
  func.func @ffn_resident_kernel(%arg0: i32, %arg1: memref<1xi32, #tpu.memory_space<smem>>, %arg2: memref<16x128xf32, #tpu.memory_space<vmem>>, %arg3: memref<128x128xf32, #tpu.memory_space<vmem>>, %arg4: memref<1x128xf32, #tpu.memory_space<vmem>>, %arg5: memref<128x128xf32, #tpu.memory_space<vmem>>, %arg6: memref<1x128xf32, #tpu.memory_space<vmem>>, %arg7: memref<16x128xf32, #tpu.memory_space<vmem>>) attributes {dimension_semantics = [#tpu.dimension_semantics<parallel>], iteration_bounds = array<i64: 1>, scalar_prefetch = 1 : i64, scratch_operands = 0 : i64, tpu.core_type = #tpu.core_type<tc>, window_params = [{transform_indices = @transform_0, window_bounds = array<i64: 16, 128>}, {pipeline_mode = #tpu.pipeline_mode<synchronous>, transform_indices = @transform_1, window_bounds = array<i64: 128, 128>}, {pipeline_mode = #tpu.pipeline_mode<synchronous>, transform_indices = @transform_2, window_bounds = array<i64: 1, 128>}, {pipeline_mode = #tpu.pipeline_mode<synchronous>, transform_indices = @transform_3, window_bounds = array<i64: 128, 128>}, {pipeline_mode = #tpu.pipeline_mode<synchronous>, transform_indices = @transform_4, window_bounds = array<i64: 1, 128>}, {transform_indices = @transform_5, window_bounds = array<i64: 16, 128>}]} {
    %c0 = arith.constant 0 : index
    %c0_0 = arith.constant 0 : index
    %0 = vector.load %arg2[%c0, %c0_0] : memref<16x128xf32, #tpu.memory_space<vmem>>, vector<16x128xf32>
    %c0_1 = arith.constant 0 : index
    %c0_2 = arith.constant 0 : index
    %1 = vector.load %arg3[%c0_1, %c0_2] : memref<128x128xf32, #tpu.memory_space<vmem>>, vector<128x128xf32>
    %cst = arith.constant dense<0.000000e+00> : vector<16x128xf32>
    %2 = tpu.matmul %0, %1, %cst {dimension_numbers = #tpu.dot_dimension_numbers<[1], [0], [0], [1], [0, 0, 1, 1], [], []>} : vector<16x128xf32>, vector<128x128xf32>, vector<16x128xf32> -> vector<16x128xf32>
    %c0_3 = arith.constant 0 : index
    %c0_4 = arith.constant 0 : index
    %3 = vector.load %arg4[%c0_3, %c0_4] : memref<1x128xf32, #tpu.memory_space<vmem>>, vector<1x128xf32>
    %4 = vector.broadcast %3 : vector<1x128xf32> to vector<16x128xf32>
    %5 = arith.addf %2, %4 : vector<16x128xf32>
    %cst_5 = arith.constant 0.000000e+00 : f32
    %6 = vector.broadcast %cst_5 : f32 to vector<16x128xf32>
    %7 = arith.maximumf %5, %6 : vector<16x128xf32>
    %c0_6 = arith.constant 0 : index
    %c0_7 = arith.constant 0 : index
    %8 = vector.load %arg5[%c0_6, %c0_7] : memref<128x128xf32, #tpu.memory_space<vmem>>, vector<128x128xf32>
    %cst_8 = arith.constant dense<0.000000e+00> : vector<16x128xf32>
    %9 = tpu.matmul %7, %8, %cst_8 {dimension_numbers = #tpu.dot_dimension_numbers<[1], [0], [0], [1], [0, 0, 1, 1], [], []>} : vector<16x128xf32>, vector<128x128xf32>, vector<16x128xf32> -> vector<16x128xf32>
    %c0_9 = arith.constant 0 : index
    %c0_10 = arith.constant 0 : index
    %10 = vector.load %arg6[%c0_9, %c0_10] : memref<1x128xf32, #tpu.memory_space<vmem>>, vector<1x128xf32>
    %11 = vector.broadcast %10 : vector<1x128xf32> to vector<16x128xf32>
    %12 = arith.addf %9, %11 : vector<16x128xf32>
    %c0_11 = arith.constant 0 : index
    %c0_12 = arith.constant 0 : index
    %13 = vector.load %arg7[%c0_11, %c0_12] : memref<16x128xf32, #tpu.memory_space<vmem>>, vector<16x128xf32>
    tpu.vector_store %arg7[%c0_11, %c0_12], %12 {strides = array<i32>} : memref<16x128xf32, #tpu.memory_space<vmem>>, vector<16x128xf32>,
    return
  }
  func.func @transform_0(%arg0: i32, %arg1: memref<1xi32, #tpu.memory_space<smem>>) -> (i32, i32) {
    %c0_i32 = arith.constant 0 : i32
    %c0_i32_0 = arith.constant 0 : i32
    return %arg0, %c0_i32 : i32, i32
  }
  func.func @transform_1(%arg0: i32, %arg1: memref<1xi32, #tpu.memory_space<smem>>) -> (i32, i32) {
    %c0_i32 = arith.constant 0 : i32
    %c0_i32_0 = arith.constant 0 : i32
    %c0_i32_1 = arith.constant 0 : i32
    return %c0_i32, %c0_i32_0 : i32, i32
  }
  func.func @transform_2(%arg0: i32, %arg1: memref<1xi32, #tpu.memory_space<smem>>) -> (i32, i32) {
    %c0_i32 = arith.constant 0 : i32
    %c0_i32_0 = arith.constant 0 : i32
    %c0_i32_1 = arith.constant 0 : i32
    return %c0_i32, %c0_i32_0 : i32, i32
  }
  func.func @transform_3(%arg0: i32, %arg1: memref<1xi32, #tpu.memory_space<smem>>) -> (i32, i32) {
    %c0_i32 = arith.constant 0 : i32
    %c0_i32_0 = arith.constant 0 : i32
    %c0_i32_1 = arith.constant 0 : i32
    return %c0_i32, %c0_i32_0 : i32, i32
  }
  func.func @transform_4(%arg0: i32, %arg1: memref<1xi32, #tpu.memory_space<smem>>) -> (i32, i32) {
    %c0_i32 = arith.constant 0 : i32
    %c0_i32_0 = arith.constant 0 : i32
    %c0_i32_1 = arith.constant 0 : i32
    return %c0_i32, %c0_i32_0 : i32, i32
  }
  func.func @transform_5(%arg0: i32, %arg1: memref<1xi32, #tpu.memory_space<smem>>) -> (i32, i32) {
    %c0_i32 = arith.constant 0 : i32
    %c0_i32_0 = arith.constant 0 : i32
    return %arg0, %c0_i32 : i32, i32
  }
}

</mosaic_0001>

<bundles_post_ra>
// kernel: tpu_custom_call.1
= control target key start
LH: loop header
LB: loop body
LE: loop exit
PB: predicated region body
PF: predicated region fallthrough
CT: control target
= control target key end

     0   :  { %12 = vsyncpa [#allocation5], 0  ;;  %s670_s0 = inlined_call_operand.<no memory space> [shape: s32[1], index: 0, kind: input, shape index: {}]   ;;  %s671_s1 = inlined_call_operand.hbm [shape: f32[16,128], index: 1, kind: input, shape index: {}]   ;;  %s672_s2 = inlined_call_operand.hbm [shape: f32[128,128], index: 2, kind: input, shape index: {}]   ;;  %s673_s3 = inlined_call_operand.vmem [shape: f32[1,128], index: 3, kind: input, shape index: {}]   ;;  %s674_s4 = inlined_call_operand.hbm [shape: f32[128,128], index: 4, kind: input, shape index: {}]   ;;  %s675_s5 = inlined_call_operand.vmem [shape: f32[1,128], index: 5, kind: input, shape index: {}]   ;;  %s676_s6 = inlined_call_operand.hbm [shape: f32[16,128], index: 6, kind: output, shape index: {}]  }
   0x1   :  { %13 = vsyncpa [#allocation8], 0 }
   0x2   :  { %14 = vsyncpa [#allocation6], 0  ;;  %s556_s0 = smov [#allocation7]   ;;  %s557_s22 = smov [#allocation4]  }
   0x3   :  { %s32_s21 = sshll.u32 %s556_s0, 4  ;;  %s20_s23 = sshll.u32 %s557_s22, 4  ;;  %s33_s21 = int_to_ptr.vmem [resolvable:$true] %s32_s21  ;;  %s597_s23 = int_to_ptr.vmem [resolvable:$true] %s20_s23 }
   0x4   :  { %s462_s26 = scalar_lea.hbm %s672_s2, 2048 }
   0x5   :  { %p463_p0 = scmp.ne.s32.totalorder %s672_s2, %s462_s26  ;;  %p466_p1 = scmp.lt.u32.totalorder %s462_s26, %s672_s2 }
   0x7   :  { %p468_p2 = pnand %p466_p1, %p463_p0 }
   0x9   :  { %471 = shalt.err (!%p468_p2)
}
   0xa   :  { %s472_s7 = scalar_lea.vmem %s33_s21, 2048  ;;  %p477_p4 = scmp.lt.s32.totalorder %s33_s21, %s33_s21 }
   0xb   :  { %p473_p3 = scmp.ne.s32.totalorder %s33_s21, %s472_s7  ;;  %p478_p5 = scmp.lt.s32.totalorder %s472_s7, %s472_s7 }
   0xd   :  { %p479_p6 = por %p478_p5, %p477_p4 }
   0xf   :  { %p480_p7 = pnand %p479_p6, %p473_p3 }
  0x11   :  { %483 = shalt.err (!%p480_p7)
}
  0x12   :  { %s558_s8 = smov 128   ;;  %s559_s9 = smov 8  }
  0x13   :  { %38 = dma.hbm_to_vmem [thread:$0]  %s672_s2, 2048, %s33_s21, [#allocation8], %s558_s8, %s558_s8, %s559_s9  }
  0x14   :  { %s484_s14 = scalar_lea.hbm %s671_s1, 256 }
  0x15   :  { %p485_p8 = scmp.ne.s32.totalorder %s671_s1, %s484_s14  ;;  %p488_p9 = scmp.lt.u32.totalorder %s484_s14, %s671_s1 }
  0x17   :  { %p490_p10 = pnand %p488_p9, %p485_p8 }
  0x19   :  { %493 = shalt.err (!%p490_p10)
}
  0x1a   :  { %s494_s19 = scalar_lea.vmem %s597_s23, 256  ;;  %p499_p12 = scmp.lt.s32.totalorder %s597_s23, %s597_s23 }
  0x1b   :  { %p495_p11 = scmp.ne.s32.totalorder %s597_s23, %s494_s19  ;;  %p500_p13 = scmp.lt.s32.totalorder %s494_s19, %s494_s19 }
  0x1d   :  { %p501_p0 = por %p500_p13, %p499_p12 }
  0x1f   :  { %p502_p1 = pnand %p501_p0, %p495_p11 }
  0x21   :  { %505 = shalt.err (!%p502_p1)
}
  0x22   :  { %26 = dma.hbm_to_vmem [thread:$0]  %s671_s1, 256, %s597_s23, [#allocation5], %s558_s8, %s558_s8, %s559_s9  }
  0x23   :  { %s560_s0 = smov [#allocation9]   ;;  %s506_s25 = scalar_lea.hbm %s674_s4, 2048 }
  0x24   :  { %s46_s21 = sshll.u32 %s560_s0, 4  ;;  %p507_p2 = scmp.ne.s32.totalorder %s674_s4, %s506_s25  ;;  %s47_s21 = int_to_ptr.vmem [resolvable:$true] %s46_s21 }
  0x25   :  { %p510_p3 = scmp.lt.u32.totalorder %s506_s25, %s674_s4 }
  0x27   :  { %p512_p4 = pnand %p510_p3, %p507_p2 }
  0x29   :  { %515 = shalt.err (!%p512_p4)
}
  0x2a   :  { %s516_s30 = scalar_lea.vmem %s47_s21, 2048  ;;  %p521_p6 = scmp.lt.s32.totalorder %s47_s21, %s47_s21 }
  0x2b   :  { %p517_p5 = scmp.ne.s32.totalorder %s47_s21, %s516_s30  ;;  %p522_p7 = scmp.lt.s32.totalorder %s516_s30, %s516_s30 }
  0x2d   :  { %p523_p8 = por %p522_p7, %p521_p6 }
  0x2f   :  { %p524_p9 = pnand %p523_p8, %p517_p5 }
  0x31   :  { %527 = shalt.err (!%p524_p9)
}
  0x32   :  { %52 = dma.hbm_to_vmem [thread:$0]  %s674_s4, 2048, %s47_s21, [#allocation8], %s558_s8, %s558_s8, %s559_s9  }
  0x33   :  { %550 = dma.done.wait [#allocation5], 256  }
  0x34   :  { %551 = vsyncadd [#allocation5], 4294967040 }
  0x35   :  { %552 = dma.done.wait [#allocation8], 4096  }
  0x36   :  { %553 = vsyncadd [#allocation8], 4294963200  ;;  %v66_v0 = vld [vmem:[#allocation7] sm:$0xff]  ;;  %v67_v1 = vld [vmem:[#allocation7 + $0x8] sm:$0xff]  ;;  %s561_s12 = smov [#allocation10]  }
  0x37   :  { %v68_v2 = vld [vmem:[#allocation7 + $0x10] sm:$0xff]  ;;  %v392_v3 = vpack.c.bf16 %v67_v1, %v66_v0  ;;  %v69_v4 = vld [vmem:[#allocation7 + $0x18] sm:$0xff]  ;;  %v70_v6 = vld [vmem:[#allocation7 + $0x20] sm:$0xff]  ;;  %s271_s13 = sshll.u32 %s561_s12, 4  ;;  %s272_s13 = int_to_ptr.vmem [resolvable:$true] %s271_s13 }
  0x38   :  { %v396_v5 = vpack.c.bf16 %v69_v4, %v68_v2  ;;  %v71_v7 = vld [vmem:[#allocation7 + $0x28] sm:$0xff]  ;;  %v72_v9 = vld [vmem:[#allocation7 + $0x30] sm:$0xff]  ;;  %v73_v10 = vld [vmem:[#allocation7 + $0x38] sm:$0xff]  ;;  %p533_p11 = scmp.lt.s32.totalorder %s272_s13, %s272_s13 }
  0x39   :  { %393 = vmatprep.subr.bf16.mxu0 %v392_v3  ;;  %v400_v8 = vpack.c.bf16 %v71_v7, %v70_v6  ;;  %v64_v11 = vld [vmem:[#allocation4] sm:$0xff]  ;;  %v166_v12 = vld [vmem:[#allocation9] sm:$0xff]  ;;  %v167_v13 = vld [vmem:[#allocation9 + $0x8] sm:$0xff]  ;;  %v404_v20 = vpack.c.bf16 %v73_v10, %v72_v9 }
  0x3a   :  { %395 = vmatpush3.bf16.msra.mxu0 %v392_v3  ;;  %354 = vmatprep.mubr.f32.mxu0 %v64_v11  ;;  %v168_v14 = vld [vmem:[#allocation9 + $0x10] sm:$0xff]  ;;  %v424_v15 = vpack.c.bf16 %v167_v13, %v166_v12  ;;  %v169_v16 = vld [vmem:[#allocation9 + $0x18] sm:$0xff]  ;;  %v170_v18 = vld [vmem:[#allocation9 + $0x20] sm:$0xff] }
  0x3b   :  { %397 = vmatprep.subr.bf16.mxu0 %v396_v5  ;;  %v428_v17 = vpack.c.bf16 %v169_v16, %v168_v14  ;;  %v171_v19 = vld [vmem:[#allocation9 + $0x28] sm:$0xff]  ;;  %v74_v21 = vld [vmem:[#allocation7 + $0x40] sm:$0xff]  ;;  %v172_v24 = vld [vmem:[#allocation9 + $0x30] sm:$0xff] }
  0x3c   :  { %425 = vmatprep.subr.bf16.mxu1 %v424_v15  ;;  %v75_v22 = vld [vmem:[#allocation7 + $0x48] sm:$0xff]  ;;  %v432_v23 = vpack.c.bf16 %v171_v19, %v170_v18  ;;  %v173_v25 = vld [vmem:[#allocation9 + $0x38] sm:$0xff]  ;;  %v76_v27 = vld [vmem:[#allocation7 + $0x50] sm:$0xff] }
  0x3d   :  { %427 = vmatpush3.bf16.msra.mxu1 %v424_v15  ;;  %v408_v26 = vpack.c.bf16 %v75_v22, %v74_v21  ;;  %v77_v28 = vld [vmem:[#allocation7 + $0x58] sm:$0xff]  ;;  %v436_v29 = vpack.c.bf16 %v173_v25, %v172_v24  ;;  %v174_v30 = vld [vmem:[#allocation9 + $0x40] sm:$0xff]  ;;  %v175_v31 = vld [vmem:[#allocation9 + $0x48] sm:$0xff] }
  0x3e   :  { %399 = vmatpush3.bf16.msra.mxu0 %v396_v5  ;;  %429 = vmatprep.subr.bf16.mxu1 %v428_v17  ;;  %v412_v32 = vpack.c.bf16 %v77_v28, %v76_v27  ;;  %v78_v33 = vld [vmem:[#allocation7 + $0x60] sm:$0xff]  ;;  %v79_v34 = vld [vmem:[#allocation7 + $0x68] sm:$0xff]  ;;  %v440_v35 = vpack.c.bf16 %v175_v31, %v174_v30  ;;  %v176_v36 = vld [vmem:[#allocation9 + $0x50] sm:$0xff] }
  0x3f   :  { %401 = vmatprep.subr.bf16.mxu0 %v400_v8  ;;  %v177_v37 = vld [vmem:[#allocation9 + $0x58] sm:$0xff]  ;;  %v416_v38 = vpack.c.bf16 %v79_v34, %v78_v33  ;;  %v80_v39 = vld [vmem:[#allocation7 + $0x70] sm:$0xff]  ;;  %v178_v42 = vld [vmem:[#allocation9 + $0x60] sm:$0xff] }
  0x40   :  { %v81_v40 = vld [vmem:[#allocation7 + $0x78] sm:$0xff]  ;;  %v444_v41 = vpack.c.bf16 %v177_v37, %v176_v36  ;;  %v179_v43 = vld [vmem:[#allocation9 + $0x68] sm:$0xff]  ;;  %v180_v47 = vld [vmem:[#allocation9 + $0x70] sm:$0xff] }
  0x41   :  { %431 = vmatpush3.bf16.msra.mxu1 %v428_v17  ;;  %v420_v44 = vpack.c.bf16 %v81_v40, %v80_v39  ;;  %v448_v45 = vpack.c.bf16 %v179_v43, %v178_v42  ;;  %v65_v46 = vld [vmem:[#allocation4 + $0x8] sm:$0xff]  ;;  %v284_v50 = vld [vmem:[%s673_s3] ss:$0 sm:$0xff]  ;;  %s528_s3 = scalar_lea.vmem %s272_s13, 256 }
  0x42   :  { %403 = vmatpush3.bf16.msra.mxu0 %v400_v8  ;;  %433 = vmatprep.subr.bf16.mxu1 %v432_v23  ;;  %v181_v48 = vld [vmem:[#allocation9 + $0x78] sm:$0xff]  ;;  %v285_v57 = vld [vmem:[%s675_s5] ss:$0 sm:$0xff]  ;;  %p529_p10 = scmp.ne.s32.totalorder %s272_s13, %s528_s3  ;;  %p534_p12 = scmp.lt.s32.totalorder %s528_s3, %s528_s3 }
  0x43   :  { %405 = vmatprep.subr.bf16.mxu0 %v404_v20  ;;  %v452_v49 = vpack.c.bf16 %v181_v48, %v180_v47 }
  0x44   :  { %p535_p13 = por %p534_p12, %p533_p11 }
  0x45   :  { %435 = vmatpush3.bf16.msra.mxu1 %v432_v23 }
  0x46   :  { %407 = vmatpush3.bf16.msra.mxu0 %v404_v20  ;;  %437 = vmatprep.subr.bf16.mxu1 %v436_v29  ;;  %p536_p0 = pnand %p535_p13, %p529_p10 }
  0x47   :  { %409 = vmatprep.subr.bf16.mxu0 %v408_v26 }
  0x49   :  { %439 = vmatpush3.bf16.msra.mxu1 %v436_v29 }
  0x4a   :  { %411 = vmatpush3.bf16.msra.mxu0 %v408_v26  ;;  %441 = vmatprep.subr.bf16.mxu1 %v440_v35 }
  0x4b   :  { %413 = vmatprep.subr.bf16.mxu0 %v412_v32 }
  0x4d   :  { %443 = vmatpush3.bf16.msra.mxu1 %v440_v35 }
  0x4e   :  { %415 = vmatpush3.bf16.msra.mxu0 %v412_v32  ;;  %445 = vmatprep.subr.bf16.mxu1 %v444_v41 }
  0x4f   :  { %417 = vmatprep.subr.bf16.mxu0 %v416_v38 }
  0x51   :  { %447 = vmatpush3.bf16.msra.mxu1 %v444_v41 }
  0x52   :  { %419 = vmatpush3.bf16.msra.mxu0 %v416_v38  ;;  %449 = vmatprep.subr.bf16.mxu1 %v448_v45 }
  0x53   :  { %421 = vmatprep.subr.bf16.mxu0 %v420_v44 }
  0x55   :  { %451 = vmatpush3.bf16.msra.mxu1 %v448_v45 }
  0x56   :  { %423 = vmatpush3.bf16.msra.mxu0 %v420_v44  ;;  %453 = vmatprep.subr.bf16.mxu1 %v452_v49 }
  0x59   :  { %355 = vmatmul.mubr.f32.vlgmr.msra.gmra.mrb[0].mxu0 %v65_v46  ;;  %455 = vmatpush3.bf16.msra.mxu1 %v452_v49 }
 0x12c   :  { %v356_v51 = vpop.f32.mrb[0].mxu0 }
 0x12d   :  { %v161_v52 = vadd.f32 %v356_v51, %v284_v50  ;;  %v155_v53 = vpop.f32.mrb[1].mxu0 }
 0x12e   :  { %v156_v54 = vadd.f32 %v284_v50, %v155_v53 }
 0x12f   :  { %v165_v56 = vmax.f32 %v161_v52, 0.0 }
 0x130   :  { %v164_v55 = vmax.f32 %v156_v54, 0.0 }
 0x132   :  { %389 = vmatprep.mubr.f32.mxu1 %v164_v55 }
 0x133   :  { %390 = vmatmul.mubr.f32.vlgmr.msra.gmra.mrb[0].mxu1 %v165_v56 }
 0x206   :  { %v391_v58 = vpop.f32.mrb[0].mxu1 }
 0x207   :  { %v261_v59 = vadd.f32 %v391_v58, %v285_v57  ;;  %v255_v60 = vpop.f32.mrb[1].mxu1 }
 0x208   :  { %v256_v61 = vadd.f32 %v285_v57, %v255_v60 }
 0x209   :  { %265 = vst [vmem:[#allocation10 + $0x8] sm:$0xff] %v261_v59 }
 0x20a   :  { %264 = vst [vmem:[#allocation10] sm:$0xff] %v256_v61 }
 0x20b   :  { %539 = shalt.err (!%p536_p0)
}
 0x20c   :  { %s540_s5 = scalar_lea.hbm %s676_s6, 256 }
 0x20d   :  { %p541_p1 = scmp.ne.s32.totalorder %s676_s6, %s540_s5  ;;  %p544_p2 = scmp.lt.u32.totalorder %s540_s5, %s676_s6 }
 0x20f   :  { %p546_p3 = pnand %p544_p2, %p541_p1 }
 0x211   :  { %549 = shalt.err (!%p546_p3)
}
 0x212   :  { %277 = dma.vmem_to_hbm [thread:$0]  %s272_s13, 256, %s676_s6, [#allocation6], %s558_s8, %s558_s8, %s559_s9  }
 0x213   :  { %554 = dma.done.wait [#allocation6], 256  }
 0x214   :  { %555 = vsyncadd [#allocation6], 4294967040 }
 0x215   :  { %281 = vsyncpa [#allocation5], 1 }
 0x216   :  { %282 = vsyncpa [#allocation8], 1 }
 0x217   :  { %283 = vsyncpa [#allocation6], 1 }

</bundles_post_ra>
